<compile_context>
chip_gen: v7x
topology: tpu7x:2x2x1
jax: 0.10.0
libtpu: 0.0.40
codegen_flags: <defaults>
</compile_context>

<pallas_src>
import functools

import jax
import jax.numpy as jnp
from jax.experimental import pallas as pl
from jax.experimental.pallas import tpu as pltpu


# ---------------------------------------------------------------------------
# Kernel
# ---------------------------------------------------------------------------
def dwconv_kernel(x_ref, wf_ref, bf_ref, o_ref, *, width):
    # x_ref : (nb, Cin, H*W)     activations, channels on sublanes, H*W on lanes
    # wf_ref: (Cout, 3*Cin)      fused weights, taps stacked on the contraction
    # bf_ref: (Cout, 1)          fused bias (always f32)
    # o_ref : (nb, Cout, H*W)
    nb, _, hw = x_ref.shape
    cout = o_ref.shape[1]

    wf = wf_ref[...]                                     # (Cout, 3*Cin) tiny
    # Hoisted once per grid step (JAX does not CSE broadcast_in_dim).
    bf = jnp.broadcast_to(bf_ref[...], (cout, hw))       # (Cout, HW) f32

    # Lane-position mask for the zero-padded H edges: a shift by one image row
    # along flattened H*W is a shift by `width` lanes.
    pos = jax.lax.broadcasted_iota(jnp.int32, (1, hw), 1)
    m_lo = pos >= width            # lanes where the x[h-1] tap is valid
    m_hi = pos < (hw - width)      # lanes where the x[h+1] tap is valid

    # In-kernel loop (not a Python unroll): working set stays one image.
    @pl.loop(0, nb)
    def _(n):
        x = x_ref[n]                                                    # (Cin, HW)
        x_m1 = jnp.where(m_lo, pltpu.roll(x, shift=width, axis=1), 0)   # x[h-1]
        x_p1 = jnp.where(m_hi, pltpu.roll(x, shift=hw - width, axis=1), 0)  # x[h+1]
        x_stack = jnp.concatenate([x_m1, x, x_p1], axis=0)              # (3*Cin, HW)
        acc = jnp.dot(wf, x_stack, preferred_element_type=jnp.float32)  # (Cout, HW)
        o_ref[n] = (acc + bf).astype(o_ref.dtype)


# ---------------------------------------------------------------------------
# Batch-tile selection: VMEM-byte budget + pipeline depth target
# ---------------------------------------------------------------------------
def _pick_batch_tile(n, per_image_bytes, *, vmem_block_budget=24 << 20, min_steps=8):
    """Images per grid step.

    * Whole problem <= 1 MiB: single grid step (per-step + launch overhead
      dominates; nothing to overlap).
    * Otherwise cap nb so double-buffered in+out blocks fit `vmem_block_budget`
      (safe on v7x's 64 MiB VMEM), and aim for >= `min_steps` grid steps so
      each TensorCore gets several steps of DMA/compute overlap.
    """
    total = n * per_image_bytes
    if total <= (1 << 20):
        return n
    nb_vmem = max(1, vmem_block_budget // (2 * per_image_bytes))
    nb_steps = max(1, n // min_steps)
    nb_target = max(1, min(nb_vmem, nb_steps, n))
    for nb in range(nb_target, 0, -1):
        if n % nb == 0:
            return nb
    return 1


# ---------------------------------------------------------------------------
# Wrapper
# ---------------------------------------------------------------------------
def dwconv_forward(x_nchw, wf_flat, bf, *, compute_dtype=None, out_dtype=None):
    """x_nchw: (N, Cin, H, W).  wf_flat: (Cout, 3*Cin), bf: (Cout, 1) f32.

    Returns (N, Cout, H, W), matching PyTorch DWConv.forward.

    compute_dtype=jnp.bfloat16 halves the input HBM stream (accumulation stays
    f32 via preferred_element_type); the kernel is memory-bound on all of
    v5e/v6e/v7x so this is worthwhile everywhere.  out_dtype defaults to the
    compute dtype so the store stream is halved too; pass jnp.float32 to keep
    an f32 output.
    """
    N, Cin, H, W = x_nchw.shape
    Cout = wf_flat.shape[0]
    HW = H * W

    # Free contiguous reshape (no transpose, no extra HBM pass).
    x = x_nchw.reshape(N, Cin, HW)
    if compute_dtype is not None and compute_dtype != x.dtype:
        x = x.astype(compute_dtype)
        wf_flat = wf_flat.astype(compute_dtype)
    if out_dtype is None:
        out_dtype = x.dtype

    in_b = jnp.dtype(x.dtype).itemsize
    out_b = jnp.dtype(out_dtype).itemsize
    per_image = HW * (Cin * in_b + Cout * out_b)
    nb = _pick_batch_tile(N, per_image)
    grid = (N // nb,)

    weight_bytes = (wf_flat.size * jnp.dtype(wf_flat.dtype).itemsize
                    + bf.size * jnp.dtype(bf.dtype).itemsize)
    vmem_need = 2 * nb * per_image + 2 * weight_bytes
    vmem_limit = int(min(max(32 << 20, 2 * vmem_need), 48 << 20))

    out = pl.pallas_call(
        functools.partial(dwconv_kernel, width=W),
        out_shape=jax.ShapeDtypeStruct((N, Cout, HW), out_dtype),
        grid_spec=pltpu.PrefetchScalarGridSpec(
            num_scalar_prefetch=0,
            grid=grid,
            in_specs=[
                pl.BlockSpec((nb, Cin, HW), lambda i: (i, 0, 0)),
                pl.BlockSpec((Cout, 3 * Cin), lambda i: (0, 0)),
                pl.BlockSpec((Cout, 1), lambda i: (0, 0)),
            ],
            out_specs=pl.BlockSpec((nb, Cout, HW), lambda i: (i, 0, 0)),
        ),
        compiler_params=pltpu.CompilerParams(
            dimension_semantics=("parallel",),
            vmem_limit_bytes=vmem_limit),
    )(x, wf_flat, bf)

    return out.reshape(N, Cout, H, W)


# ---------------------------------------------------------------------------
# Parameter handling (PyTorch layout in, fused kernel layout out)
# ---------------------------------------------------------------------------
def init_torch_params(key, in_channels, out_channels):
    """Deterministic synthetic params in the PyTorch nn.Module shapes:
       depth_conv.weight (Cin,1,3,1), depth_conv.bias (Cin,),
       point_conv.weight (Cout,Cin,1,1), point_conv.bias (Cout,)."""
    k1, k2, k3, k4 = jax.random.split(key, 4)
    wd_t = jax.random.normal(k1, (in_channels, 1, 3, 1), jnp.float32) * 0.1
    bd = jax.random.normal(k2, (in_channels,), jnp.float32) * 0.1
    wp_t = jax.random.normal(k3, (out_channels, in_channels, 1, 1), jnp.float32) * 0.1
    bp = jax.random.normal(k4, (out_channels,), jnp.float32) * 0.1
    return wd_t, bd, wp_t, bp


def fuse_params(wd_t, bd, wp_t, bp):
    """Fold the depthwise taps into the pointwise weight (once, outside the kernel):
         wf_flat[o, k*Cin + c] = wd[k, c] * wp[o, c]      (Cout, 3*Cin)
         bf[o]                 = sum_c wp[o, c]*bd[c] + bp (Cout, 1)
    Column order matches the kernel's RHS stack [x(h-1); x(h); x(h+1)].
    """
    cin = wd_t.shape[0]
    cout = wp_t.shape[0]
    wd = jnp.transpose(wd_t[:, 0, :, 0], (1, 0))                   # (3, Cin)
    wp = wp_t[:, :, 0, 0]                                           # (Cout, Cin)
    wf = wd[:, None, :] * wp[None, :, :]                            # (3, Cout, Cin)
    wf_flat = jnp.transpose(wf, (1, 0, 2)).reshape(cout, 3 * cin)   # (Cout, 3*Cin)
    bf = (wp @ bd + bp)[:, None].astype(jnp.float32)                # (Cout, 1)
    return wf_flat, bf


# ---------------------------------------------------------------------------
# Pure-JAX reference (unfused, NCHW) — validates the kernel AND the fusion.
# ---------------------------------------------------------------------------
def dwconv_reference(x, wd_t, bd, wp_t, bp):
    wd = wd_t[:, 0, :, 0]                                # (Cin, 3)
    z = jnp.zeros_like(x[:, :, :1, :])
    x_m1 = jnp.concatenate([z, x[:, :, :-1, :]], axis=2)
    x_p1 = jnp.concatenate([x[:, :, 1:, :], z], axis=2)
    y = (wd[:, 0][None, :, None, None] * x_m1
         + wd[:, 1][None, :, None, None] * x
         + wd[:, 2][None, :, None, None] * x_p1
         + bd[None, :, None, None])
    wp = wp_t[:, :, 0, 0]                                # (Cout, Cin)
    out = jnp.einsum('nchw,oc->nohw', y, wp) + bp[None, :, None, None]
    return out


if __name__ == "__main__":
    N, Cin, H, W = 2, 4, 16, 16
    Cout = 8

    key = jax.random.PRNGKey(0)
    kx, kp = jax.random.split(key)
    x = jax.random.normal(kx, (N, Cin, H, W), jnp.float32)
    wd_t, bd, wp_t, bp = init_torch_params(kp, Cin, Cout)

    wf_flat, bf = fuse_params(wd_t, bd, wp_t, bp)
    out = dwconv_forward(x, wf_flat, bf)          # f32 path (exact vs reference)
    out = jax.block_until_ready(out)

    ref = dwconv_reference(x, wd_t, bd, wp_t, bp)
    assert out.shape == (N, Cout, H, W)
    assert jnp.allclose(out, ref, atol=1e-5, rtol=1e-5)

    print("KERNEL_OK")
</pallas_src>

<mosaic_0001>
module attributes {stable_mosaic.version = 11 : i64} {
  func.func @dwconv_kernel(%arg0: i32, %arg1: memref<2x4x256xf32, #tpu.memory_space<vmem>>, %arg2: memref<8x12xf32, #tpu.memory_space<vmem>>, %arg3: memref<8x1xf32, #tpu.memory_space<vmem>>, %arg4: memref<2x8x256xf32, #tpu.memory_space<vmem>>) attributes {dimension_semantics = [#tpu.dimension_semantics<parallel>], iteration_bounds = array<i64: 1>, scalar_prefetch = 0 : i64, scratch_operands = 0 : i64, tpu.core_type = #tpu.core_type<tc>, window_params = [{transform_indices = @transform_0, window_bounds = array<i64: 2, 4, 256>}, {pipeline_mode = #tpu.pipeline_mode<synchronous>, transform_indices = @transform_1, window_bounds = array<i64: 8, 12>}, {pipeline_mode = #tpu.pipeline_mode<synchronous>, transform_indices = @transform_2, window_bounds = array<i64: 8, 1>}, {transform_indices = @transform_3, window_bounds = array<i64: 2, 8, 256>}]} {
    %c0 = arith.constant 0 : index
    %c0_0 = arith.constant 0 : index
    %0 = vector.load %arg2[%c0, %c0_0] : memref<8x12xf32, #tpu.memory_space<vmem>>, vector<8x12xf32>
    %c0_1 = arith.constant 0 : index
    %c0_2 = arith.constant 0 : index
    %1 = vector.load %arg3[%c0_1, %c0_2] : memref<8x1xf32, #tpu.memory_space<vmem>>, vector<8x1xf32>
    %2 = vector.shape_cast %1 : vector<8x1xf32> to vector<8x1xf32>
    %3 = vector.broadcast %2 : vector<8x1xf32> to vector<8x256xf32>
    %4 = tpu.iota {dimensions = array<i32: 1>} : vector<1x256xi32>
    %c16_i32 = arith.constant 16 : i32
    %5 = vector.broadcast %c16_i32 : i32 to vector<1x256xi32>
    %6 = arith.cmpi sge, %4, %5 : vector<1x256xi32>
    %c240_i32 = arith.constant 240 : i32
    %7 = vector.broadcast %c240_i32 : i32 to vector<1x256xi32>
    %8 = arith.cmpi slt, %4, %7 : vector<1x256xi32>
    %c0_i32 = arith.constant 0 : i32
    %c2_i32 = arith.constant 2 : i32
    %9 = arith.addi %c0_i32, %c2_i32 : i32
    %c1_i32 = arith.constant 1 : i32
    scf.for %arg5 = %c0_i32 to %9 step %c1_i32  : i32 {
      %c1_i32_4 = arith.constant 1 : i32
      %10 = arith.muli %arg5, %c1_i32_4 : i32
      %c0_i32_5 = arith.constant 0 : i32
      %11 = arith.addi %c0_i32_5, %10 : i32
      %12 = arith.index_cast %11 : i32 to index
      %c0_6 = arith.constant 0 : index
      %c0_7 = arith.constant 0 : index
      %13 = vector.load %arg1[%12, %c0_6, %c0_7] : memref<2x4x256xf32, #tpu.memory_space<vmem>>, vector<1x4x256xf32>
      %14 = vector.shape_cast %13 : vector<1x4x256xf32> to vector<4x256xf32>
      %c16_i32_8 = arith.constant 16 : i32
      %15 = tpu.dynamic_rotate %14 by %c16_i32_8 dim 1 : vector<4x256xf32>, i32 -> vector<4x256xf32>
      %c0_i32_9 = arith.constant 0 : i32
      %16 = arith.sitofp %c0_i32_9 : i32 to f32
      %17 = vector.shape_cast %6 : vector<1x256xi1> to vector<1x256xi1>
      %18 = vector.broadcast %17 : vector<1x256xi1> to vector<4x256xi1>
      %19 = vector.broadcast %16 : f32 to vector<4x256xf32>
      %20 = arith.select %18, %15, %19 : vector<4x256xi1>, vector<4x256xf32>
      %c240_i32_10 = arith.constant 240 : i32
      %21 = tpu.dynamic_rotate %14 by %c240_i32_10 dim 1 : vector<4x256xf32>, i32 -> vector<4x256xf32>
      %c0_i32_11 = arith.constant 0 : i32
      %22 = arith.sitofp %c0_i32_11 : i32 to f32
      %23 = vector.shape_cast %8 : vector<1x256xi1> to vector<1x256xi1>
      %24 = vector.broadcast %23 : vector<1x256xi1> to vector<4x256xi1>
      %25 = vector.broadcast %22 : f32 to vector<4x256xf32>
      %26 = arith.select %24, %21, %25 : vector<4x256xi1>, vector<4x256xf32>
      %27 = tpu.concatenate %20, %14, %26 in 0 : vector<4x256xf32>, vector<4x256xf32>, vector<4x256xf32> -> vector<12x256xf32>
      %cst = arith.constant dense<0.000000e+00> : vector<8x256xf32>
      %28 = tpu.matmul %0, %27, %cst {dimension_numbers = #tpu.dot_dimension_numbers<[1], [0], [0], [1], [0, 0, 1, 1], [], []>} : vector<8x12xf32>, vector<12x256xf32>, vector<8x256xf32> -> vector<8x256xf32>
      %29 = arith.addf %28, %3 : vector<8x256xf32>
      %30 = arith.index_cast %11 : i32 to index
      %c0_12 = arith.constant 0 : index
      %c0_13 = arith.constant 0 : index
      %31 = vector.load %arg4[%30, %c0_12, %c0_13] : memref<2x8x256xf32, #tpu.memory_space<vmem>>, vector<1x8x256xf32>
      %32 = vector.shape_cast %31 : vector<1x8x256xf32> to vector<8x256xf32>
      %33 = vector.shape_cast %29 : vector<8x256xf32> to vector<1x8x256xf32>
      tpu.vector_store %arg4[%30, %c0_12, %c0_13], %33 {strides = array<i32>} : memref<2x8x256xf32, #tpu.memory_space<vmem>>, vector<1x8x256xf32>,
    }
    %c2_i32_3 = arith.constant 2 : i32
    return
  }
  func.func @transform_0(%arg0: i32) -> (i32, i32, i32) {
    %c0_i32 = arith.constant 0 : i32
    %c0_i32_0 = arith.constant 0 : i32
    %c0_i32_1 = arith.constant 0 : i32
    return %arg0, %c0_i32, %c0_i32_0 : i32, i32, i32
  }
  func.func @transform_1(%arg0: i32) -> (i32, i32) {
    %c0_i32 = arith.constant 0 : i32
    %c0_i32_0 = arith.constant 0 : i32
    %c0_i32_1 = arith.constant 0 : i32
    return %c0_i32, %c0_i32_0 : i32, i32
  }
  func.func @transform_2(%arg0: i32) -> (i32, i32) {
    %c0_i32 = arith.constant 0 : i32
    %c0_i32_0 = arith.constant 0 : i32
    %c0_i32_1 = arith.constant 0 : i32
    return %c0_i32, %c0_i32_0 : i32, i32
  }
  func.func @transform_3(%arg0: i32) -> (i32, i32, i32) {
    %c0_i32 = arith.constant 0 : i32
    %c0_i32_0 = arith.constant 0 : i32
    %c0_i32_1 = arith.constant 0 : i32
    return %arg0, %c0_i32, %c0_i32_0 : i32, i32, i32
  }
}

</mosaic_0001>

<bundles_post_ra>
// kernel: tpu_custom_call.1
= control target key start
LH: loop header
LB: loop body
LE: loop exit
PB: predicated region body
PF: predicated region fallthrough
CT: control target
= control target key end

     0   :  { %8 = vsyncpa [#allocation3], 0  ;;  %s373_s0 = inlined_call_operand.hbm [shape: f32[2,4,256], index: 0, kind: input, shape index: {}]   ;;  %s374_s1 = inlined_call_operand.vmem [shape: f32[8,12], index: 1, kind: input, shape index: {}]   ;;  %s375_s2 = inlined_call_operand.vmem [shape: f32[8,1], index: 2, kind: input, shape index: {}]   ;;  %s376_s3 = inlined_call_operand.hbm [shape: f32[2,8,256], index: 3, kind: output, shape index: {}]  }
   0x1   :  { %9 = vsyncpa [#allocation4], 0  ;;  %s300_s12 = smov [#allocation2]   ;;  %s244_s16 = scalar_lea.hbm %s373_s0, 256 }
   0x2   :  { %s15_s13 = sshll.u32 %s300_s12, 4  ;;  %p245_p0 = scmp.ne.s32.totalorder %s373_s0, %s244_s16  ;;  %s16_s13 = int_to_ptr.vmem [resolvable:$true] %s15_s13 }
   0x3   :  { %p248_p1 = scmp.lt.u32.totalorder %s244_s16, %s373_s0 }
   0x5   :  { %p250_p2 = pnand %p248_p1, %p245_p0 }
   0x7   :  { %253 = shalt.err (!%p250_p2)
}
   0x8   :  { %s254_s21 = scalar_lea.vmem %s16_s13, 256  ;;  %p259_p4 = scmp.lt.s32.totalorder %s16_s13, %s16_s13 }
   0x9   :  { %p255_p3 = scmp.ne.s32.totalorder %s16_s13, %s254_s21  ;;  %p260_p5 = scmp.lt.s32.totalorder %s254_s21, %s254_s21 }
   0xb   :  { %p261_p6 = por %p260_p5, %p259_p4 }
   0xd   :  { %p262_p7 = pnand %p261_p6, %p255_p3 }
   0xf   :  { %265 = shalt.err (!%p262_p7)
}
  0x10   :  { %s301_s22 = smov 128   ;;  %s302_s23 = smov 8  }
  0x11   :  { %21 = dma.hbm_to_vmem [thread:$0]  %s373_s0, 256, %s16_s13, [#allocation3], %s301_s22, %s301_s22, %s302_s23  }
  0x12   :  { %292 = dma.done.wait [#allocation3], 256  }
  0x13   :  { %293 = vsyncadd [#allocation3], 4294967040  ;;  %v303_v0 = vmov 0   ;;  %v36_v1 = vlaneseq  ;;  %v29_v4 = vld [vmem:[%s374_s1] sm:$0xff]  ;;  %s349_s0 = smov 0  }
  0x14   :  { %231 = vset.pattern.permute.xlu0 %v303_v0  ;;  %v30_v5 = vld [vmem:[%s375_s2] sm:$0xff] }
  0x15   :  { %v37_v2 = vand.u32 127, %v36_v1  ;;  %33 = vperm.xlu0 %231, %v30_v5  }
  0x17   :  { %v38_v3 = vadd.s32 128, %v37_v2  ;;  %vm39_vm0 = vcmp.ge.s32.totalorder %v37_v2, 16 }
  0x19   :  { %vm42_vm1 = vcmp.lt.s32.totalorder %v38_v3, 240 }
  0x94   :  { %v34_v6 = vpop.permute.xlu0 %33 }
  0x95 LB: > { %s204_s30 = sshll.u32 %s298_s0, 3  ;;  %v304_v10 = vmov 0.0   ;;  %s305_s1 = smov 16   ;;  %vm60_vm2 = vcmp.lt.s32.totalorder %v37_v2, 16  ;;  %vm73_vm3 = vcmp.lt.s32.totalorder %v37_v2, 112  ;;  %vm84_vm4 = vcmask 1043456   ;;  %s298_s0 = sphi %s349_s0, %s48_s0  }
  0x96   : > { %s51_s4 = scalar_lea.vmem [#allocation2], %s204_s30  ;;  %161 = vmatprep.mubr.f32.mxu0 %v304_v10  ;;  %s306_s2 = smov 112   ;;  %vm307_vm5 = vmmov 1   ;;  %vm87_vm7 = vcmask 97280  }
  0x97   : > { %v52_v7 = vld [vmem:[%s51_s4] sm:$0xff]  ;;  %vm207_vm6 = vmpackc.low %vm84_vm4, %vm307_vm5  ;;  %s205_s5 = sshll.u32 %s298_s0, 4  ;;  %s48_s0 = sadd.s32 1, %s298_s0  }
  0x98   : > { %v54_v8 = vcombine.high %v52_v7, %v52_v7  ;;  %v82_v19 = vcombine.low %v52_v7, %v52_v7  ;;  %s169_s6 = scalar_lea.vmem [#allocation5], %s205_s5  ;;  %p45_p8 = scmp.ge.s32.totalorder %s48_s0, 2  }
  0x99   :  { %s308_s7 = smov (%p45_p8), [#allocation5]  }
  0x9a   : > { %v232_v9 = vpack.i.bf16 %v54_v8, %v52_v7  ;;  %s177_s8 = sshll.u32 (%p45_p8), %s308_s7, 4  ;;  %s178_s8 = int_to_ptr.vmem [resolvable:$true] %s177_s8 }
  0x9b   :  { %s266_s9 = scalar_lea.vmem (%p45_p8), %s178_s8, 512  ;;  %p271_p10 = scmp.lt.s32.totalorder (%p45_p8), %s178_s8, %s178_s8 }
  0x9c   : > { %233 = vrot.lane.b32.xlu0 %v232_v9, %s305_s1  ;;  %p267_p9 = scmp.ne.s32.totalorder (%p45_p8), %s178_s8, %s266_s9  ;;  %p272_p11 = scmp.lt.s32.totalorder (%p45_p8), %s266_s9, %s266_s9 }
  0x9e   :  { %p273_p12 = por (%p45_p8), %p272_p11, %p271_p10 }
  0xa0   : > { %238 = vrot.lane.b32.xlu0 %v232_v9, %s306_s2  ;;  %p274_p13 = pnand (%p45_p8), %p273_p12, %p267_p9 }
 0x10e   : > { %v234_v11 = vpop.permute.xlu0 %233 }
 0x10f   : > { %v236_v12 = vunpack.i.h.bf16 %v234_v11  ;;  %v235_v13 = vunpack.i.l.bf16 %v234_v11 }
 0x111   : > { %v62_v14 = vsel %vm60_vm2, %v236_v12, %v235_v13  ;;  %v61_v18 = vsel %vm60_vm2, %v235_v13, %v236_v12 }
 0x112   : > { %v239_v15 = vpop.permute.xlu0 %238  ;;  %v67_v20 = vsel %vm39_vm0, %v62_v14, 0.0  ;;  %v86_v24 = vsel %vm84_vm4, %v61_v18, %v52_v7 }
 0x113   : > { %v241_v16 = vunpack.i.h.bf16 %v239_v15  ;;  %v240_v17 = vunpack.i.l.bf16 %v239_v15  ;;  %v85_v26 = vsel %vm84_vm4, %v67_v20, %v82_v19 }
 0x115   : > { %v75_v21 = vsel %vm73_vm3, %v241_v16, %v240_v17  ;;  %v74_v22 = vsel %vm73_vm3, %v240_v17, %v241_v16 }
 0x116   : > { %v81_v23 = vsel %vm42_vm1, %v75_v21, 0.0  ;;  %v209_v27 = vpack.c.bf16 %v74_v22, %v85_v26 }
 0x117   : > { %v206_v25 = vpack.c.bf16 %v81_v23, %v86_v24 }
 0x119   : > { %208 = vmatprep.subr.msk.bf16.mxu0 %vm207_vm6, %v206_v25 }
 0x11a   : > { %211 = vmatpush1.bf16.msk.msra.mxu0 %vm207_vm6, %v209_v27 }
 0x11d   : > { %202 = vmatmul.mubr.msk.f32.vlgmr.msra.gmra.mrb[0].mxu0 %vm87_vm7, %v29_v4 }
 0x1ee   :  { %47 = sbr.rel (!%p45_p8) target bundleno = 149 (0x95), region = 45 }
 0x1f0   : > { %v163_v28 = vpop.f32.mrb[0].mxu0 }
 0x1f1   : > { %v164_v29 = vadd.f32 %v163_v28, %v34_v6  ;;  %v165_v30 = vpop.f32.mrb[1].mxu0 }
 0x1f2   : > { %v166_v31 = vadd.f32 %v165_v30, %v34_v6 }
 0x1f3   : > { %170 = vst [vmem:[%s169_s6] sm:$0xff] %v164_v29 }
 0x1f4   : > { %171 = vst [vmem:[%s169_s6 + $0x8] sm:$0xff] %v166_v31 }
 0x1f5   :  { %277 = shalt.err (!%p274_p13)
}
 0x1f6   :  { %s278_s12 = scalar_lea.hbm %s376_s3, 512 }
 0x1f7   :  { %p279_p0 = scmp.ne.s32.totalorder %s376_s3, %s278_s12  ;;  %p282_p1 = scmp.lt.u32.totalorder %s278_s12, %s376_s3 }
 0x1f9   :  { %p284_p2 = pnand %p282_p1, %p279_p0 }
 0x1fb   :  { %287 = shalt.err (!%p284_p2)
}
 0x1fc   :  { %s309_s17 = smov 256   ;;  %s310_s18 = smov 16  }
 0x1fd   :  { %183 = dma.vmem_to_hbm [thread:$0]  %s178_s8, 512, %s376_s3, [#allocation4], %s309_s17, %s309_s17, %s310_s18  }
 0x1fe   :  { %294 = dma.done.wait [#allocation4], 512  }
 0x1ff   :  { %295 = vsyncadd [#allocation4], 4294966784 }
 0x200   :  { %187 = vsyncpa [#allocation3], 1 }
 0x201   :  { %188 = vsyncpa [#allocation4], 1 }

</bundles_post_ra>
